<compile_context>
chip_gen: v6e
topology: v6e:2x2x1
jax: 0.10.0
libtpu: 0.0.40
codegen_flags: <defaults>
</compile_context>

<pallas_src>
import functools

import jax
import jax.numpy as jnp
from jax import lax
from jax.experimental import pallas as pl
from jax.experimental.pallas import tpu as pltpu

_LANE = 128
_ACC_ROWS_MAX = 256  # fixed accumulator height (32 vregs of f32)


def _cdiv(a, b):
    return (a + b - 1) // b


def _round_up(a, b):
    return _cdiv(a, b) * b


def _softplus_neg(d):
    # -log(sigmoid(d)) == softplus(-d), numerically stable and VALU-trimmed:
    #   log1p(exp(min(d, -d))) - min(d, 0)
    return jnp.log1p(jnp.exp(jnp.minimum(d, -d))) - jnp.minimum(d, 0.0)


def _tpu_defaults():
    """(tensorcores_per_device, max_tile_rows) from the local device kind."""
    num_cores, max_rows = 1, 4096          # conservative fallback (fits v5e)
    try:
        kind = jax.local_devices()[0].device_kind.lower()
        if "v7" in kind:                   # 2 TCs, 3.2 TB/s HBM, 32 MiB scoped
            num_cores, max_rows = 2, 8192
        elif "v4" in kind or "v5p" in kind:  # megacore (2 TCs)
            num_cores, max_rows = 2, 8192
        elif "v6" in kind:                 # 1 TC, 32 MiB scoped VMEM
            num_cores, max_rows = 1, 8192
        # v5e / "v5 lite": keep (1, 4096) -> 8 MiB double-buffered f32 inputs,
        # safely under its 16 MiB default scoped VMEM.
    except Exception:
        pass
    return num_cores, max_rows


def _transr_loss_kernel(true_ref, false_ref, out_ref, acc_ref, *,
                        tile_rows, acc_rows, n_chunks, rows_valid,
                        total_tiles, num_splits):
    # grid = (num_splits ["parallel"], tiles_per_split ["arbitrary"])
    split = pl.program_id(0)
    step = pl.program_id(1)

    @pl.when(step == 0)
    def _():
        acc_ref[...] = jnp.zeros_like(acc_ref)

    # Interleaved tile assignment: split s handles tiles s, s+num_splits, ...
    tile_idx = step * num_splits + split
    tile_valid = tile_idx < total_tiles
    # Interior tile: every row of the block lies inside the aligned prefix.
    is_interior = (tile_idx + 1) * tile_rows <= rows_valid
    tile_row_off = tile_idx * tile_rows

    def accumulate(masked):
        def body(c, carry):
            r0 = pl.multiple_of(c * acc_rows, acc_rows)
            # In-kernel cast (inputs may be bf16 in HBM).
            # TODO(synk): on v7x with bf16 inputs, compute softplus in bf16 and
            # widen only at the accumulate to halve VALU/EUP issue.
            t = true_ref[pl.ds(r0, acc_rows), :].astype(jnp.float32)
            f = false_ref[pl.ds(r0, acc_rows), :].astype(jnp.float32)
            loss = _softplus_neg(f - t)
            if masked:
                # Rows past the aligned prefix (partial edge block) hold
                # uninitialized VMEM; zero them BEFORE accumulating.
                row = (lax.broadcasted_iota(jnp.int32, loss.shape, 0)
                       + tile_row_off + r0)
                loss = jnp.where(row < rows_valid, loss, 0.0)
            acc_ref[...] += loss
            return carry
        unroll = n_chunks if n_chunks <= 8 else 8
        lax.fori_loop(0, n_chunks, body, 0, unroll=unroll)

    # Fast path: the vast majority of tiles need no per-element mask.
    @pl.when(tile_valid & is_interior)
    def _():
        accumulate(masked=False)

    # Boundary tile only: row mask against the aligned-prefix row count.
    @pl.when(tile_valid & jnp.logical_not(is_interior))
    def _():
        accumulate(masked=True)

    @pl.when(step == pl.num_programs(1) - 1)
    def _():
        out_ref[...] = jnp.sum(acc_ref[...]).reshape(1, 1, 1)


def transr_loss(true_plausibility, false_plausibility, *,
                max_tile_rows=None, num_splits=None):
    """Pallas implementation of TransRLoss.forward. Returns a scalar f32."""
    assert true_plausibility.shape == false_plausibility.shape
    n = int(true_plausibility.size)
    assert n > 0
    assert n < 2 ** 31, "int32 row-index math in the kernel"

    auto_cores, auto_rows = _tpu_defaults()
    if max_tile_rows is None:
        max_tile_rows = auto_rows
    if num_splits is None:
        num_splits = auto_cores

    t_flat = true_plausibility.reshape(-1)
    f_flat = false_plausibility.reshape(-1)

    rows = n // _LANE                 # 128-aligned prefix handled by the kernel
    n_aligned = rows * _LANE
    tail = n - n_aligned

    # <128-element ragged tail folded in with plain jnp (no whole-array pad).
    tail_loss = jnp.zeros((), jnp.float32)
    if tail:
        dt = (f_flat[n_aligned:].astype(jnp.float32)
              - t_flat[n_aligned:].astype(jnp.float32))
        tail_loss = jnp.sum(_softplus_neg(dt))

    if rows == 0:
        return tail_loss

    # TODO(synk): for non-128-aligned n the prefix slice still costs one fused
    # copy per input; fully zero-copy would need a manual-DMA (pl.ANY) path.
    t2 = t_flat[:n_aligned].reshape(rows, _LANE)
    f2 = f_flat[:n_aligned].reshape(rows, _LANE)

    # Tile / accumulator sizing: fixed small acc, input tiles as big as the
    # generation's scoped-VMEM budget allows, tile_rows a multiple of acc_rows.
    if rows <= _ACC_ROWS_MAX:
        acc_rows = _round_up(rows, 8)
        tile_rows = acc_rows
    else:
        acc_rows = _ACC_ROWS_MAX
        tile_rows = min(_round_up(max_tile_rows, acc_rows),
                        _round_up(rows, acc_rows))
    n_chunks = tile_rows // acc_rows
    total_tiles = _cdiv(rows, tile_rows)

    # Split across TensorCores only when the chip has >1 TC and >1 tile.
    num_splits = max(1, min(num_splits, total_tiles))
    tiles_per_split = _cdiv(total_tiles, num_splits)

    def in_map(s, i):
        tile = i * num_splits + s      # interleaved across splits
        # Clamp so an uneven split never issues an out-of-bounds DMA; the
        # duplicated tile's accumulate is skipped by the in-kernel scalar gate.
        return (jnp.minimum(tile, total_tiles - 1), 0)

    kernel = functools.partial(
        _transr_loss_kernel,
        tile_rows=tile_rows, acc_rows=acc_rows, n_chunks=n_chunks,
        rows_valid=rows, total_tiles=total_tiles, num_splits=num_splits)

    # TODO(synk): on v7x consider pltpu.CORE_PARALLEL for the split axis if the
    # plain "parallel" semantic is not actually sharded across TensorCores.
    out = pl.pallas_call(
        kernel,
        out_shape=jax.ShapeDtypeStruct((num_splits, 1, 1), jnp.float32),
        grid=(num_splits, tiles_per_split),
        in_specs=[pl.BlockSpec((tile_rows, _LANE), in_map),
                  pl.BlockSpec((tile_rows, _LANE), in_map)],
        out_specs=pl.BlockSpec((1, 1, 1), lambda s, i: (s, 0, 0)),
        scratch_shapes=[pltpu.VMEM((acc_rows, _LANE), jnp.float32)],
        compiler_params=pltpu.CompilerParams(
            dimension_semantics=("parallel", "arbitrary")),
    )(t2, f2)

    return jnp.sum(out) + tail_loss


def transr_loss_ref(true_p, false_p):
    """Pure-JAX reference matching the PyTorch module."""
    diff = false_p.astype(jnp.float32) - true_p.astype(jnp.float32)
    return -jnp.sum(jax.nn.log_sigmoid(diff))


if __name__ == "__main__":
    key = jax.random.PRNGKey(0)
    k1, k2, k3, k4, k5, k6 = jax.random.split(key, 6)

    # 1) Small 128-aligned f32 batch of plausibility scores.
    batch = 256
    tp = jax.random.normal(k1, (batch,), dtype=jnp.float32)
    fp = jax.random.normal(k2, (batch,), dtype=jnp.float32)
    loss = jax.block_until_ready(transr_loss(tp, fp))
    ref = transr_loss_ref(tp, fp)
    assert jnp.allclose(loss, ref, rtol=1e-5, atol=1e-3), (loss, ref)

    # 2) Ragged, non-128-aligned bf16 input: exercises the in-kernel cast,
    #    masked boundary tile, and the jnp tail fold-in.
    m = 1000
    tp2 = jax.random.normal(k3, (m,), dtype=jnp.bfloat16)
    fp2 = jax.random.normal(k4, (m,), dtype=jnp.bfloat16)
    loss2 = jax.block_until_ready(transr_loss(tp2, fp2))
    ref2 = transr_loss_ref(tp2, fp2)
    assert jnp.allclose(loss2, ref2, rtol=1e-3, atol=1e-2), (loss2, ref2)

    # 3) Force multi-tile + interleaved 2-way split (odd tile count exercises
    #    the clamped duplicate tile) with small tiles so the test stays small.
    p = 140850
    tp3 = jax.random.normal(k5, (p,), dtype=jnp.float32)
    fp3 = jax.random.normal(k6, (p,), dtype=jnp.float32)
    loss3 = jax.block_until_ready(
        transr_loss(tp3, fp3, max_tile_rows=256, num_splits=2))
    ref3 = transr_loss_ref(tp3, fp3)
    assert jnp.allclose(loss3, ref3, rtol=1e-4, atol=1e-1), (loss3, ref3)

    print("KERNEL_OK")
</pallas_src>

<mosaic_0001>
module attributes {stable_mosaic.version = 11 : i64} {
  func.func @_transr_loss_kernel(%arg0: i32, %arg1: i32, %arg2: memref<8x128xf32, #tpu.memory_space<vmem>>, %arg3: memref<8x128xf32, #tpu.memory_space<vmem>>, %arg4: memref<1x1x1xf32, #tpu.memory_space<vmem>>, %arg5: memref<8x128xf32, #tpu.memory_space<vmem>>) attributes {dimension_semantics = [#tpu.dimension_semantics<parallel>, #tpu.dimension_semantics<arbitrary>], iteration_bounds = array<i64: 1, 1>, scalar_prefetch = 0 : i64, scratch_operands = 1 : i64, tpu.core_type = #tpu.core_type<tc>, window_params = [{transform_indices = @transform_0, window_bounds = array<i64: 8, 128>}, {transform_indices = @transform_1, window_bounds = array<i64: 8, 128>}, {transform_indices = @transform_2, window_bounds = array<i64: 1, 1, 1>}]} {
    %c0_i32 = arith.constant 0 : i32
    %0 = arith.cmpi eq, %arg1, %c0_i32 : i32
    %1 = arith.extui %0 : i1 to i32
    %c0_i32_0 = arith.constant 0 : i32
    %2 = arith.cmpi ne, %1, %c0_i32_0 : i32
    scf.if %2 {
      %cst = arith.constant 0.000000e+00 : f32
      %20 = vector.broadcast %cst : f32 to vector<8x128xf32>
      %c0 = arith.constant 0 : index
      %c0_8 = arith.constant 0 : index
      %21 = vector.load %arg5[%c0, %c0_8] : memref<8x128xf32, #tpu.memory_space<vmem>>, vector<8x128xf32>
      tpu.vector_store %arg5[%c0, %c0_8], %20 {strides = array<i32>} : memref<8x128xf32, #tpu.memory_space<vmem>>, vector<8x128xf32>,
    } else {
    }
    %c1_i32 = arith.constant 1 : i32
    %3 = arith.muli %arg1, %c1_i32 : i32
    %4 = arith.addi %3, %arg0 : i32
    %c1_i32_1 = arith.constant 1 : i32
    %5 = arith.cmpi slt, %4, %c1_i32_1 : i32
    %c1_i32_2 = arith.constant 1 : i32
    %6 = arith.addi %4, %c1_i32_2 : i32
    %c8_i32 = arith.constant 8 : i32
    %7 = arith.muli %6, %c8_i32 : i32
    %c2_i32 = arith.constant 2 : i32
    %8 = arith.cmpi sle, %7, %c2_i32 : i32
    %c8_i32_3 = arith.constant 8 : i32
    %9 = arith.muli %4, %c8_i32_3 : i32
    %10 = arith.andi %5, %8 : i1
    %11 = arith.extui %10 : i1 to i32
    %c0_i32_4 = arith.constant 0 : i32
    %12 = arith.cmpi ne, %11, %c0_i32_4 : i32
    scf.if %12 {
      %c0_i32_8 = arith.constant 0 : i32
      %c8_i32_9 = arith.constant 8 : i32
      %20 = arith.muli %c0_i32_8, %c8_i32_9 : i32
      %21 = tpu.assume_multiple %20, 8 : i32
      %22 = arith.index_cast %21 : i32 to index
      %c0 = arith.constant 0 : index
      %23 = vector.load %arg2[%22, %c0] : memref<8x128xf32, #tpu.memory_space<vmem>>, vector<8x128xf32>
      %24 = arith.index_cast %21 : i32 to index
      %c0_10 = arith.constant 0 : index
      %25 = vector.load %arg3[%24, %c0_10] : memref<8x128xf32, #tpu.memory_space<vmem>>, vector<8x128xf32>
      %26 = arith.subf %25, %23 : vector<8x128xf32>
      %cst = arith.constant 0.000000e+00 : f32
      %27 = vector.broadcast %cst : f32 to vector<8x128xf32>
      %28 = arith.subf %27, %26 : vector<8x128xf32>
      %29 = arith.minimumf %26, %28 : vector<8x128xf32>
      %30 = math.exp %29 : vector<8x128xf32>
      %31 = math.log1p %30 : vector<8x128xf32>
      %cst_11 = arith.constant 0.000000e+00 : f32
      %32 = vector.broadcast %cst_11 : f32 to vector<8x128xf32>
      %33 = arith.minimumf %26, %32 : vector<8x128xf32>
      %34 = arith.subf %31, %33 : vector<8x128xf32>
      %c0_12 = arith.constant 0 : index
      %c0_13 = arith.constant 0 : index
      %35 = vector.load %arg5[%c0_12, %c0_13] : memref<8x128xf32, #tpu.memory_space<vmem>>, vector<8x128xf32>
      %36 = arith.addf %35, %34 : vector<8x128xf32>
      %c0_14 = arith.constant 0 : index
      %c0_15 = arith.constant 0 : index
      %37 = vector.load %arg5[%c0_14, %c0_15] : memref<8x128xf32, #tpu.memory_space<vmem>>, vector<8x128xf32>
      tpu.vector_store %arg5[%c0_14, %c0_15], %36 {strides = array<i32>} : memref<8x128xf32, #tpu.memory_space<vmem>>, vector<8x128xf32>,
      %c1_i32_16 = arith.constant 1 : i32
    } else {
    }
    %true = arith.constant true
    %13 = arith.xori %8, %true : i1
    %14 = arith.andi %5, %13 : i1
    %15 = arith.extui %14 : i1 to i32
    %c0_i32_5 = arith.constant 0 : i32
    %16 = arith.cmpi ne, %15, %c0_i32_5 : i32
    scf.if %16 {
      %c0_i32_8 = arith.constant 0 : i32
      %c8_i32_9 = arith.constant 8 : i32
      %20 = arith.muli %c0_i32_8, %c8_i32_9 : i32
      %21 = tpu.assume_multiple %20, 8 : i32
      %22 = arith.index_cast %21 : i32 to index
      %c0 = arith.constant 0 : index
      %23 = vector.load %arg2[%22, %c0] : memref<8x128xf32, #tpu.memory_space<vmem>>, vector<8x128xf32>
      %24 = arith.index_cast %21 : i32 to index
      %c0_10 = arith.constant 0 : index
      %25 = vector.load %arg3[%24, %c0_10] : memref<8x128xf32, #tpu.memory_space<vmem>>, vector<8x128xf32>
      %26 = arith.subf %25, %23 : vector<8x128xf32>
      %cst = arith.constant 0.000000e+00 : f32
      %27 = vector.broadcast %cst : f32 to vector<8x128xf32>
      %28 = arith.subf %27, %26 : vector<8x128xf32>
      %29 = arith.minimumf %26, %28 : vector<8x128xf32>
      %30 = math.exp %29 : vector<8x128xf32>
      %31 = math.log1p %30 : vector<8x128xf32>
      %cst_11 = arith.constant 0.000000e+00 : f32
      %32 = vector.broadcast %cst_11 : f32 to vector<8x128xf32>
      %33 = arith.minimumf %26, %32 : vector<8x128xf32>
      %34 = arith.subf %31, %33 : vector<8x128xf32>
      %35 = tpu.iota {dimensions = array<i32: 0>} : vector<8x128xi32>
      %36 = vector.broadcast %9 : i32 to vector<8x128xi32>
      %37 = arith.addi %35, %36 : vector<8x128xi32>
      %38 = vector.broadcast %21 : i32 to vector<8x128xi32>
      %39 = arith.addi %37, %38 : vector<8x128xi32>
      %c2_i32_12 = arith.constant 2 : i32
      %40 = vector.broadcast %c2_i32_12 : i32 to vector<8x128xi32>
      %41 = arith.cmpi slt, %39, %40 : vector<8x128xi32>
      %cst_13 = arith.constant 0.000000e+00 : f32
      %42 = vector.broadcast %cst_13 : f32 to vector<8x128xf32>
      %43 = arith.select %41, %34, %42 : vector<8x128xi1>, vector<8x128xf32>
      %c0_14 = arith.constant 0 : index
      %c0_15 = arith.constant 0 : index
      %44 = vector.load %arg5[%c0_14, %c0_15] : memref<8x128xf32, #tpu.memory_space<vmem>>, vector<8x128xf32>
      %45 = arith.addf %44, %43 : vector<8x128xf32>
      %c0_16 = arith.constant 0 : index
      %c0_17 = arith.constant 0 : index
      %46 = vector.load %arg5[%c0_16, %c0_17] : memref<8x128xf32, #tpu.memory_space<vmem>>, vector<8x128xf32>
      tpu.vector_store %arg5[%c0_16, %c0_17], %45 {strides = array<i32>} : memref<8x128xf32, #tpu.memory_space<vmem>>, vector<8x128xf32>,
      %c1_i32_18 = arith.constant 1 : i32
    } else {
    }
    %c0_i32_6 = arith.constant 0 : i32
    %17 = arith.cmpi eq, %arg1, %c0_i32_6 : i32
    %18 = arith.extui %17 : i1 to i32
    %c0_i32_7 = arith.constant 0 : i32
    %19 = arith.cmpi ne, %18, %c0_i32_7 : i32
    scf.if %19 {
      %c0 = arith.constant 0 : index
      %c0_8 = arith.constant 0 : index
      %20 = vector.load %arg5[%c0, %c0_8] : memref<8x128xf32, #tpu.memory_space<vmem>>, vector<8x128xf32>
      %21 = vector.shape_cast %20 : vector<8x128xf32> to vector<1x8x128xf32>
      %cst = arith.constant dense<0.000000e+00> : vector<1xf32>
      %22 = vector.multi_reduction <add>, %21, %cst [1, 2] : vector<1x8x128xf32> to vector<1xf32>
      %23 = vector.shape_cast %22 : vector<1xf32> to vector<1x1x1xf32>
      %24 = vector.extract %23[0, 0, 0] : f32 from vector<1x1x1xf32>
      %25 = vector.broadcast %24 : f32 to vector<1x1x1xf32>
      %c0_9 = arith.constant 0 : index
      %c0_10 = arith.constant 0 : index
      %c0_11 = arith.constant 0 : index
      %26 = vector.load %arg4[%c0_9, %c0_10, %c0_11] : memref<1x1x1xf32, #tpu.memory_space<vmem>>, vector<1x1x1xf32>
      tpu.vector_store %arg4[%c0_9, %c0_10, %c0_11], %25 {strides = array<i32>} : memref<1x1x1xf32, #tpu.memory_space<vmem>>, vector<1x1x1xf32>,
    } else {
    }
    return
  }
  func.func @transform_0(%arg0: i32, %arg1: i32) -> (i32, i32) {
    %c1_i32 = arith.constant 1 : i32
    %0 = arith.muli %arg1, %c1_i32 : i32
    %1 = arith.addi %0, %arg0 : i32
    %c0_i32 = arith.constant 0 : i32
    %2 = arith.minsi %1, %c0_i32 : i32
    %c0_i32_0 = arith.constant 0 : i32
    %c0_i32_1 = arith.constant 0 : i32
    return %2, %c0_i32_0 : i32, i32
  }
  func.func @transform_1(%arg0: i32, %arg1: i32) -> (i32, i32) {
    %c1_i32 = arith.constant 1 : i32
    %0 = arith.muli %arg1, %c1_i32 : i32
    %1 = arith.addi %0, %arg0 : i32
    %c0_i32 = arith.constant 0 : i32
    %2 = arith.minsi %1, %c0_i32 : i32
    %c0_i32_0 = arith.constant 0 : i32
    %c0_i32_1 = arith.constant 0 : i32
    return %2, %c0_i32_0 : i32, i32
  }
  func.func @transform_2(%arg0: i32, %arg1: i32) -> (i32, i32, i32) {
    %c0_i32 = arith.constant 0 : i32
    %c0_i32_0 = arith.constant 0 : i32
    %c0_i32_1 = arith.constant 0 : i32
    return %arg0, %c0_i32, %c0_i32_0 : i32, i32, i32
  }
}

</mosaic_0001>

<bundles_post_ra>
// kernel: tpu_custom_call.1
= control target key start
LH: loop header
LB: loop body
LE: loop exit
PB: predicated region body
PF: predicated region fallthrough
CT: control target
= control target key end

     0   :  { %7 = vsyncpa [#allocation4], 0  ;;  %s284_s0 = inlined_call_operand.hbm [shape: f32[2,128], index: 0, kind: input, shape index: {}]   ;;  %s285_s1 = inlined_call_operand.hbm [shape: f32[2,128], index: 1, kind: input, shape index: {}]   ;;  %s286_s2 = inlined_call_operand.hbm [shape: f32[1,1,1], index: 2, kind: output, shape index: {}]  }
   0x1   :  { %8 = vsyncpa [#allocation7], 0 }
   0x2   :  { %9 = vsyncpa [#allocation5], 0 }
   0x3   :  { %20 = vsyncadd [#allocation4], 96  ;;  %s255_s9 = smov [#allocation3]  }
   0x4   :  { %s25_s10 = sshll.u32 %s255_s9, 4  ;;  %s26_s10 = int_to_ptr.vmem [resolvable:$true] %s25_s10 }
   0x5   :  { %s197_s11 = scalar_lea.vmem %s26_s10, 32  ;;  %s201_s12 = scalar_lea.vmem %s26_s10, 128 }
   0x6   :  { %p198_p0 = scmp.ne.s32.totalorder %s26_s10, %s197_s11  ;;  %p202_p1 = scmp.lt.s32.totalorder %s26_s10, %s26_s10 }
   0x7   :  { %p203_p2 = scmp.lt.s32.totalorder %s201_s12, %s197_s11 }
   0x9   :  { %p204_p3 = por %p203_p2, %p202_p1 }
   0xb   :  { %p205_p4 = pnand %p204_p3, %p198_p0 }
   0xd   :  { %208 = shalt.err (!%p205_p4)
}
   0xe   :  { %s256_s13 = smov 32   ;;  %s257_s14 = smov 2  }
   0xf   :  { %31 = dma.hbm_to_vmem [thread:$0]  %s284_s0, 32, %s26_s10, [#allocation4], %s256_s13, %s256_s13, %s257_s14  }
  0x10   :  { %42 = vsyncadd [#allocation7], 96  ;;  %s258_s17 = smov [#allocation6]  }
  0x11   :  { %s47_s18 = sshll.u32 %s258_s17, 4  ;;  %s48_s18 = int_to_ptr.vmem [resolvable:$true] %s47_s18 }
  0x12   :  { %s217_s19 = scalar_lea.vmem %s48_s18, 32  ;;  %s221_s20 = scalar_lea.vmem %s48_s18, 128 }
  0x13   :  { %p218_p5 = scmp.ne.s32.totalorder %s48_s18, %s217_s19  ;;  %p222_p6 = scmp.lt.s32.totalorder %s48_s18, %s48_s18 }
  0x14   :  { %p223_p7 = scmp.lt.s32.totalorder %s221_s20, %s217_s19 }
  0x16   :  { %p224_p8 = por %p223_p7, %p222_p6 }
  0x18   :  { %p225_p9 = pnand %p224_p8, %p218_p5 }
  0x1a   :  { %228 = shalt.err (!%p225_p9)
}
  0x1b   :  { %53 = dma.hbm_to_vmem [thread:$0]  %s285_s1, 32, %s48_s18, [#allocation7], %s256_s13, %s256_s13, %s257_s14  }
  0x1c   :  { %249 = dma.done.wait [#allocation4], 128  }
  0x1d   :  { %250 = vsyncadd [#allocation4], 4294967168 }
  0x1e   :  { %251 = dma.done.wait [#allocation7], 128  }
  0x1f   :  { %252 = vsyncadd [#allocation7], 4294967168  ;;  %v113_v0 = vld [vmem:[#allocation3] sm:$0xff]  ;;  %v114_v1 = vld [vmem:[#allocation6] sm:$0xff]  ;;  %v131_v10 = vlaneseq  ;;  %s259_s0 = smov [#allocation8]   ;;  %vm156_vm2 = vcmask 0  }
  0x20   :  { %v115_v2 = vsub.f32 %v114_v1, %v113_v0  ;;  %s164_s1 = sshll.u32 %s259_s0, 4  ;;  %s165_s1 = int_to_ptr.vmem [resolvable:$true] %s164_s1 }
  0x21   :  { %v132_v13 = vshrl.u32 %v131_v10, 7  ;;  %s229_s24 = scalar_lea.vmem %s165_s1, 16  ;;  %s233_s25 = scalar_lea.vmem %s165_s1, 32 }
  0x22   :  { %v116_v3 = vsub.f32 0.0, %v115_v2  ;;  %v129_v15 = vmin.f32 %v115_v2, 0.0  ;;  %p230_p10 = scmp.ne.s32.totalorder %s165_s1, %s229_s24  ;;  %p234_p11 = scmp.lt.s32.totalorder %s165_s1, %s165_s1 }
  0x23   :  { %vm137_vm1 = vcmp.lt.s32.totalorder %v132_v13, 2  ;;  %p235_p12 = scmp.lt.s32.totalorder %s233_s25, %s229_s24 }
  0x24   :  { %v117_v4 = vmin.f32 %v115_v2, %v116_v3 }
  0x25   :  { %p236_p13 = por %p235_p12, %p234_p11 }
  0x26   :  { %v118_v5 = vmul.f32 1.442695, %v117_v4 }
  0x27   :  { %p237_p0 = pnand %p236_p13, %p230_p10 }
  0x28   :  { %185 = vpow2.f32 %v118_v5 }
  0x35   :  { %v186_v6 = vpop.eup %185 }
  0x36   :  { %v120_v7 = vadd.f32 1.0, %v186_v6  ;;  %v123_v8 = vmul.f32 -0.5, %v186_v6  ;;  %v126_v11 = vand.u32 2147483647, %v186_v6 }
  0x38   :  { %187 = vlog2.f32 %v120_v7  ;;  %v124_v9 = vadd.f32 1.0, %v123_v8  ;;  %vm127_vm0 = vcmp.lt.f32.partialorder %v126_v11, 0.0004427343 }
  0x3a   :  { %v125_v12 = vmul.f32 %v186_v6, %v124_v9 }
  0x45   :  { %v188_v14 = vpop.eup %187 }
  0x46   :  { %v122_v16 = vmul.f32 0.6931472, %v188_v14 }
  0x48   :  { %v128_v17 = vsel %vm127_vm0, %v125_v12, %v122_v16 }
  0x49   :  { %v130_v18 = vsub.f32 %v128_v17, %v129_v15 }
  0x4b   :  { %v138_v19 = vsel %vm137_vm1, %v130_v18, 0.0 }
  0x4c   :  { %146 = vadd.xlane.f32.xlu0 %v138_v19 }
  0xd5   :  { %v147_v20 = vpop.xlane.xlu0 %146 }
  0xd6   :  { %v148_v21 = vrot.slane %v147_v20, 4 }
  0xd8   :  { %v149_v22 = vadd.f32 %v148_v21, %v147_v20 }
  0xda   :  { %v150_v23 = vrot.slane %v149_v22, 2 }
  0xdc   :  { %v151_v24 = vadd.f32 %v150_v23, %v149_v22 }
  0xde   :  { %v152_v25 = vrot.slane %v151_v24, 1 }
  0xe0   :  { %v153_v26 = vadd.f32 %v152_v25, %v151_v24 }
  0xe2   :  { %178 = vpush %v153_v26 }
 0x113   :  { %s179_s23 = spop %178 }
 0x114   :  { %v155_v27 = vstv %s179_s23 }
 0x115   :  { %157 = vst.msk [vmem:[#allocation8] sm:$0x1] %vm156_vm2, %v155_v27 }
 0x116   :  { %240 = shalt.err (!%p237_p0)
}
 0x117   :  { %167 = dma.vmem_to_hbm [thread:$0]  %s165_s1, 16, %s286_s2, [#allocation5]  }
 0x118   :  { %253 = dma.done.wait [#allocation5], 16  }
 0x119   :  { %254 = vsyncadd [#allocation5], 4294967280 }
 0x11a   :  { %171 = vsyncpa [#allocation4], 1 }
 0x11b   :  { %172 = vsyncpa [#allocation7], 1 }
 0x11c   :  { %173 = vsyncpa [#allocation5], 1 }

</bundles_post_ra>
